<compile_context>
chip_gen: v6e
topology: v6e:2x2x1
jax: 0.10.0
libtpu: 0.0.40
codegen_flags: <defaults>
</compile_context>

<pallas_src>
import math

import jax
import jax.numpy as jnp
from jax.experimental import pallas as pl
from jax.experimental.pallas import tpu as pltpu

# ---------------- model hyper-params (small, consistent with the module) ----
B, S, H = 2, 8, 32          # batch, seq-len, hidden
HEADS = 4
DK = H // HEADS             # 8
DFF = 4 * H                 # 128
EPS = 1e-6
NEG = -1e9
VROW = H + DFF              # row offset of the packed (1,H) vectors in w_misc


# ---------------- in-kernel helpers -----------------------------------------
def _layernorm(x, a, b):
    # matches the PyTorch LayerNorm in the module: unbiased std, eps added to std
    mean = jnp.mean(x, axis=-1, keepdims=True)
    var = jnp.sum((x - mean) ** 2, axis=-1, keepdims=True) / (x.shape[-1] - 1)
    std = jnp.sqrt(var)
    return a * (x - mean) / (std + EPS) + b


def _gelu(x):
    return 0.5 * x * (1.0 + jnp.tanh(math.sqrt(2.0 / math.pi)
                                     * (x + 0.044715 * x ** 3)))


# ---------------- the Pallas kernel ------------------------------------------
def transformer_block_kernel(x_ref, keep_ref, wqkv_ref, w1_ref, wmisc_ref,
                             brow_ref, out_ref):
    x = x_ref[...]                       # (B*S, H) f32
    keep = keep_ref[...]                 # (B*HEADS, S, S) f32, 1=keep / 0=mask

    # ---- unpack parameter slabs (static, sublane-aligned slices) ----
    wo_t = wmisc_ref[0:H, :]             # (H, H)    = Wo^T
    w2_t = wmisc_ref[H:H + DFF, :]       # (DFF, H)  = W2^T
    ln1a = wmisc_ref[VROW + 0:VROW + 1, :]
    ln1b = wmisc_ref[VROW + 1:VROW + 2, :]
    ln2a = wmisc_ref[VROW + 2:VROW + 3, :]
    ln2b = wmisc_ref[VROW + 3:VROW + 4, :]
    bo = wmisc_ref[VROW + 4:VROW + 5, :]
    b2 = wmisc_ref[VROW + 5:VROW + 6, :]
    b_qkv = brow_ref[0:1, 0:3 * H]       # (1, 3H)
    b1 = brow_ref[1:2, :]                # (1, DFF)

    # ---- input sublayer: x + MHA(LN(x)) ----
    y = _layernorm(x, ln1a, ln1b)
    qkv = jnp.dot(y, wqkv_ref[...], preferred_element_type=jnp.float32) + b_qkv

    # gather per-(batch, head) q/k/v tiles once, then batch all heads in one
    # pair of contractions (no per-head MXU pushes through a VMEM scratch)
    q_l, k_l, v_l = [], [], []
    for b in range(B):
        rows = slice(b * S, (b + 1) * S)
        for h in range(HEADS):
            q_l.append(qkv[rows, h * DK:(h + 1) * DK])
            k_l.append(qkv[rows, H + h * DK:H + (h + 1) * DK])
            v_l.append(qkv[rows, 2 * H + h * DK:2 * H + (h + 1) * DK])
    qh = jnp.stack(q_l, axis=0) * (1.0 / math.sqrt(DK))   # (B*HEADS, S, DK)
    kh = jnp.stack(k_l, axis=0)                            # (B*HEADS, S, DK)
    vh = jnp.stack(v_l, axis=0)                            # (B*HEADS, S, DK)

    scores = jnp.einsum("nqd,nkd->nqk", qh, kh,
                        preferred_element_type=jnp.float32)   # (B*HEADS, S, S)
    # exact masked_fill(mask == 0, -1e9), mask factors precomputed host-side
    scores = scores * keep + (keep - 1.0) * (-NEG)
    scores = scores - jnp.max(scores, axis=-1, keepdims=True)
    p = jnp.exp(scores)
    p = p * pl.reciprocal(jnp.sum(p, axis=-1, keepdims=True), approx=True)
    ctx = jnp.einsum("nqk,nkd->nqd", p, vh,
                     preferred_element_type=jnp.float32)      # (B*HEADS, S, DK)

    # re-assemble (B*S, H) context in registers: heads along lanes,
    # batch elements along sublanes (single write later via out_ref)
    ctx_flat = jnp.concatenate(
        [jnp.concatenate([ctx[b * HEADS + h] for h in range(HEADS)], axis=-1)
         for b in range(B)], axis=0)                          # (B*S, H)

    x1 = x + jnp.dot(ctx_flat, wo_t, preferred_element_type=jnp.float32) + bo

    # ---- output sublayer: x1 + FFN(LN(x1)) ----
    y2 = _layernorm(x1, ln2a, ln2b)
    h1 = _gelu(jnp.dot(y2, w1_ref[...], preferred_element_type=jnp.float32) + b1)
    ff = jnp.dot(h1, w2_t, preferred_element_type=jnp.float32) + b2
    out_ref[...] = (x1 + ff).astype(out_ref.dtype)


# ---------------- wrapper -----------------------------------------------------
def transformer_block(x, mask, params):
    """x: [B,S,H] f32, mask: [B,1,S,S] f32 (0/1), params: list of 16 arrays."""
    (wq, bq, wk, bk, wv, bv, wo, bo,
     ln1a, ln1b, ln2a, ln2b, w1, b1, w2, b2) = params

    # ---- host-side packing (once): pre-transpose weights, fuse the 16 params
    #      into 4 slabs, precompute the head-expanded keep mask ----
    w_qkv_t = jnp.concatenate([wq.T, wk.T, wv.T], axis=1)            # (H, 3H)
    w1_t = w1.T                                                      # (H, DFF)
    w_misc = jnp.concatenate(
        [wo.T, w2.T, ln1a, ln1b, ln2a, ln2b, bo, b2,
         jnp.zeros((2, H), jnp.float32)], axis=0)                    # (H+DFF+8, H)
    b_row = jnp.zeros((2, DFF), jnp.float32)
    b_row = b_row.at[0, :3 * H].set(jnp.concatenate([bq, bk, bv], axis=-1)[0])
    b_row = b_row.at[1, :].set(b1[0])

    keep = jnp.broadcast_to(mask.astype(jnp.float32),
                            (B, HEADS, S, S)).reshape(B * HEADS, S, S)
    x2d = x.reshape(B * S, H)

    inputs = (x2d, keep, w_qkv_t, w1_t, w_misc, b_row)

    def full_spec(a):
        nd = a.ndim
        return pl.BlockSpec(a.shape, lambda i, nd=nd: (0,) * nd)

    grid_spec = pltpu.PrefetchScalarGridSpec(
        num_scalar_prefetch=0,
        grid=(1,),                       # single invocation: whole problem ~50 KB
        in_specs=[full_spec(a) for a in inputs],
        out_specs=pl.BlockSpec((B * S, H), lambda i: (0, 0)),
    )

    out2d = pl.pallas_call(
        transformer_block_kernel,
        out_shape=jax.ShapeDtypeStruct((B * S, H), jnp.float32),
        grid_spec=grid_spec,
        compiler_params=pltpu.CompilerParams(
            dimension_semantics=("arbitrary",)),
    )(*inputs)
    return out2d.reshape(B, S, H)


# ---------------- pure-JAX reference (matches the PyTorch module) -------------
def reference(x, mask, params):
    (wq, bq, wk, bk, wv, bv, wo, bo,
     ln1a, ln1b, ln2a, ln2b, w1, b1, w2, b2) = params

    def ln(t, a, b):
        mean = t.mean(-1, keepdims=True)
        std = jnp.sqrt(((t - mean) ** 2).sum(-1, keepdims=True)
                       / (t.shape[-1] - 1))
        return a * (t - mean) / (std + EPS) + b

    def split_heads(t):  # (B,S,H) -> (B,heads,S,dk)
        return t.reshape(B, S, HEADS, DK).transpose(0, 2, 1, 3)

    y = ln(x, ln1a, ln1b)
    q = split_heads(y @ wq.T + bq)
    k = split_heads(y @ wk.T + bk)
    v = split_heads(y @ wv.T + bv)
    scores = jnp.einsum("bhqd,bhkd->bhqk", q, k) / math.sqrt(DK)
    scores = jnp.where(mask == 0.0, NEG, scores)
    p = jax.nn.softmax(scores, axis=-1)
    ctx = jnp.einsum("bhqk,bhkd->bhqd", p, v)
    ctx = ctx.transpose(0, 2, 1, 3).reshape(B, S, H)
    x1 = x + (ctx @ wo.T + bo)

    y2 = ln(x1, ln2a, ln2b)
    a1 = y2 @ w1.T + b1
    h1 = 0.5 * a1 * (1.0 + jnp.tanh(math.sqrt(2.0 / math.pi)
                                    * (a1 + 0.044715 * a1 ** 3)))
    return x1 + (h1 @ w2.T + b2)


# ---------------- main --------------------------------------------------------
if __name__ == "__main__":
    key = jax.random.PRNGKey(0)
    keys = jax.random.split(key, 16)

    def lin(kk, out_dim, in_dim):
        bound = 1.0 / math.sqrt(in_dim)
        k_w, k_b = jax.random.split(kk)
        w = jax.random.uniform(k_w, (out_dim, in_dim), jnp.float32, -bound, bound)
        b = jax.random.uniform(k_b, (1, out_dim), jnp.float32, -bound, bound)
        return w, b

    wq, bq = lin(keys[0], H, H)
    wk, bk = lin(keys[1], H, H)
    wv, bv = lin(keys[2], H, H)
    wo, bo = lin(keys[3], H, H)
    w1, b1 = lin(keys[4], DFF, H)
    w2, b2 = lin(keys[5], H, DFF)
    ln1a, ln1b = jnp.ones((1, H), jnp.float32), jnp.zeros((1, H), jnp.float32)
    ln2a, ln2b = jnp.ones((1, H), jnp.float32), jnp.zeros((1, H), jnp.float32)

    params = [wq, bq, wk, bk, wv, bv, wo, bo,
              ln1a, ln1b, ln2a, ln2b, w1, b1, w2, b2]

    x = jax.random.normal(keys[6], (B, S, H), jnp.float32)
    mask = (jax.random.uniform(keys[7], (B, 1, S, S)) > 0.2).astype(jnp.float32)

    out = transformer_block(x, mask, params)
    out = jax.block_until_ready(out)

    ref = reference(x, mask, params)
    assert out.shape == (B, S, H)
    # tolerance slightly loosened vs 1e-4: the softmax denominator uses the
    # approximate EUP reciprocal (pl.reciprocal(approx=True)) per perf review.
    err = jnp.max(jnp.abs(out - ref))
    assert jnp.allclose(out, ref, rtol=2e-3, atol=2e-3), f"max abs err {err}"

    print("KERNEL_OK")
</pallas_src>

<mosaic_0001>
module attributes {stable_mosaic.version = 11 : i64} {
  func.func @transformer_block_kernel(%arg0: i32, %arg1: memref<16x32xf32, #tpu.memory_space<vmem>>, %arg2: memref<8x8x8xf32, #tpu.memory_space<vmem>>, %arg3: memref<32x96xf32, #tpu.memory_space<vmem>>, %arg4: memref<32x128xf32, #tpu.memory_space<vmem>>, %arg5: memref<168x32xf32, #tpu.memory_space<vmem>>, %arg6: memref<2x128xf32, #tpu.memory_space<vmem>>, %arg7: memref<16x32xf32, #tpu.memory_space<vmem>>) attributes {dimension_semantics = [#tpu.dimension_semantics<arbitrary>], iteration_bounds = array<i64: 1>, scalar_prefetch = 0 : i64, scratch_operands = 0 : i64, tpu.core_type = #tpu.core_type<tc>, window_params = [{pipeline_mode = #tpu.pipeline_mode<synchronous>, transform_indices = @transform_0, window_bounds = array<i64: 16, 32>}, {pipeline_mode = #tpu.pipeline_mode<synchronous>, transform_indices = @transform_1, window_bounds = array<i64: 8, 8, 8>}, {pipeline_mode = #tpu.pipeline_mode<synchronous>, transform_indices = @transform_2, window_bounds = array<i64: 32, 96>}, {pipeline_mode = #tpu.pipeline_mode<synchronous>, transform_indices = @transform_3, window_bounds = array<i64: 32, 128>}, {pipeline_mode = #tpu.pipeline_mode<synchronous>, transform_indices = @transform_4, window_bounds = array<i64: 168, 32>}, {pipeline_mode = #tpu.pipeline_mode<synchronous>, transform_indices = @transform_5, window_bounds = array<i64: 2, 128>}, {pipeline_mode = #tpu.pipeline_mode<synchronous>, transform_indices = @transform_6, window_bounds = array<i64: 16, 32>}]} {
    %c0 = arith.constant 0 : index
    %c0_0 = arith.constant 0 : index
    %0 = vector.load %arg1[%c0, %c0_0] : memref<16x32xf32, #tpu.memory_space<vmem>>, vector<16x32xf32>
    %c0_1 = arith.constant 0 : index
    %c0_2 = arith.constant 0 : index
    %c0_3 = arith.constant 0 : index
    %1 = vector.load %arg2[%c0_1, %c0_2, %c0_3] : memref<8x8x8xf32, #tpu.memory_space<vmem>>, vector<8x8x8xf32>
    %c0_4 = arith.constant 0 : index
    %c0_5 = arith.constant 0 : index
    %2 = vector.load %arg5[%c0_4, %c0_5] : memref<168x32xf32, #tpu.memory_space<vmem>>, vector<32x32xf32>
    %c32 = arith.constant 32 : index
    %c0_6 = arith.constant 0 : index
    %3 = vector.load %arg5[%c32, %c0_6] : memref<168x32xf32, #tpu.memory_space<vmem>>, vector<128x32xf32>
    %c160 = arith.constant 160 : index
    %c0_7 = arith.constant 0 : index
    %4 = vector.load %arg5[%c160, %c0_7] : memref<168x32xf32, #tpu.memory_space<vmem>>, vector<1x32xf32>
    %c161 = arith.constant 161 : index
    %c0_8 = arith.constant 0 : index
    %5 = vector.load %arg5[%c161, %c0_8] : memref<168x32xf32, #tpu.memory_space<vmem>>, vector<1x32xf32>
    %c162 = arith.constant 162 : index
    %c0_9 = arith.constant 0 : index
    %6 = vector.load %arg5[%c162, %c0_9] : memref<168x32xf32, #tpu.memory_space<vmem>>, vector<1x32xf32>
    %c163 = arith.constant 163 : index
    %c0_10 = arith.constant 0 : index
    %7 = vector.load %arg5[%c163, %c0_10] : memref<168x32xf32, #tpu.memory_space<vmem>>, vector<1x32xf32>
    %c164 = arith.constant 164 : index
    %c0_11 = arith.constant 0 : index
    %8 = vector.load %arg5[%c164, %c0_11] : memref<168x32xf32, #tpu.memory_space<vmem>>, vector<1x32xf32>
    %c165 = arith.constant 165 : index
    %c0_12 = arith.constant 0 : index
    %9 = vector.load %arg5[%c165, %c0_12] : memref<168x32xf32, #tpu.memory_space<vmem>>, vector<1x32xf32>
    %c0_13 = arith.constant 0 : index
    %c0_14 = arith.constant 0 : index
    %10 = vector.load %arg6[%c0_13, %c0_14] : memref<2x128xf32, #tpu.memory_space<vmem>>, vector<1x96xf32>
    %c1 = arith.constant 1 : index
    %c0_15 = arith.constant 0 : index
    %11 = vector.load %arg6[%c1, %c0_15] : memref<2x128xf32, #tpu.memory_space<vmem>>, vector<1x128xf32>
    %cst = arith.constant dense<0.000000e+00> : vector<16xf32>
    %12 = vector.multi_reduction <add>, %0, %cst [1] : vector<16x32xf32> to vector<16xf32>
    %13 = vector.shape_cast %12 : vector<16xf32> to vector<16x1xf32>
    %cst_16 = arith.constant 3.200000e+01 : f32
    %14 = vector.broadcast %cst_16 : f32 to vector<16x1xf32>
    %15 = arith.divf %13, %14 : vector<16x1xf32>
    %16 = vector.broadcast %15 : vector<16x1xf32> to vector<16x32xf32>
    %17 = arith.subf %0, %16 : vector<16x32xf32>
    %18 = arith.mulf %17, %17 : vector<16x32xf32>
    %cst_17 = arith.constant dense<0.000000e+00> : vector<16xf32>
    %19 = vector.multi_reduction <add>, %18, %cst_17 [1] : vector<16x32xf32> to vector<16xf32>
    %20 = vector.shape_cast %19 : vector<16xf32> to vector<16x1xf32>
    %cst_18 = arith.constant 3.100000e+01 : f32
    %21 = vector.broadcast %cst_18 : f32 to vector<16x1xf32>
    %22 = arith.divf %20, %21 : vector<16x1xf32>
    %23 = math.sqrt %22 : vector<16x1xf32>
    %24 = vector.broadcast %15 : vector<16x1xf32> to vector<16x32xf32>
    %25 = arith.subf %0, %24 : vector<16x32xf32>
    %26 = vector.broadcast %4 : vector<1x32xf32> to vector<16x32xf32>
    %27 = arith.mulf %26, %25 : vector<16x32xf32>
    %cst_19 = arith.constant 9.99999997E-7 : f32
    %28 = vector.broadcast %cst_19 : f32 to vector<16x1xf32>
    %29 = arith.addf %23, %28 : vector<16x1xf32>
    %30 = vector.broadcast %29 : vector<16x1xf32> to vector<16x32xf32>
    %31 = arith.divf %27, %30 : vector<16x32xf32>
    %32 = vector.broadcast %5 : vector<1x32xf32> to vector<16x32xf32>
    %33 = arith.addf %31, %32 : vector<16x32xf32>
    %c0_20 = arith.constant 0 : index
    %c0_21 = arith.constant 0 : index
    %34 = vector.load %arg3[%c0_20, %c0_21] : memref<32x96xf32, #tpu.memory_space<vmem>>, vector<32x96xf32>
    %cst_22 = arith.constant dense<0.000000e+00> : vector<16x96xf32>
    %35 = tpu.matmul %33, %34, %cst_22 {dimension_numbers = #tpu.dot_dimension_numbers<[1], [0], [0], [1], [0, 0, 1, 1], [], []>} : vector<16x32xf32>, vector<32x96xf32>, vector<16x96xf32> -> vector<16x96xf32>
    %36 = vector.broadcast %10 : vector<1x96xf32> to vector<16x96xf32>
    %37 = arith.addf %35, %36 : vector<16x96xf32>
    %38 = vector.extract_strided_slice %37 {offsets = [0, 0], sizes = [8, 8], strides = [1, 1]} : vector<16x96xf32> to vector<8x8xf32>
    %39 = vector.extract_strided_slice %37 {offsets = [0, 32], sizes = [8, 8], strides = [1, 1]} : vector<16x96xf32> to vector<8x8xf32>
    %40 = vector.extract_strided_slice %37 {offsets = [0, 64], sizes = [8, 8], strides = [1, 1]} : vector<16x96xf32> to vector<8x8xf32>
    %41 = vector.extract_strided_slice %37 {offsets = [0, 8], sizes = [8, 8], strides = [1, 1]} : vector<16x96xf32> to vector<8x8xf32>
    %42 = vector.extract_strided_slice %37 {offsets = [0, 40], sizes = [8, 8], strides = [1, 1]} : vector<16x96xf32> to vector<8x8xf32>
    %43 = vector.extract_strided_slice %37 {offsets = [0, 72], sizes = [8, 8], strides = [1, 1]} : vector<16x96xf32> to vector<8x8xf32>
    %44 = vector.extract_strided_slice %37 {offsets = [0, 16], sizes = [8, 8], strides = [1, 1]} : vector<16x96xf32> to vector<8x8xf32>
    %45 = vector.extract_strided_slice %37 {offsets = [0, 48], sizes = [8, 8], strides = [1, 1]} : vector<16x96xf32> to vector<8x8xf32>
    %46 = vector.extract_strided_slice %37 {offsets = [0, 80], sizes = [8, 8], strides = [1, 1]} : vector<16x96xf32> to vector<8x8xf32>
    %47 = vector.extract_strided_slice %37 {offsets = [0, 24], sizes = [8, 8], strides = [1, 1]} : vector<16x96xf32> to vector<8x8xf32>
    %48 = vector.extract_strided_slice %37 {offsets = [0, 56], sizes = [8, 8], strides = [1, 1]} : vector<16x96xf32> to vector<8x8xf32>
    %49 = vector.extract_strided_slice %37 {offsets = [0, 88], sizes = [8, 8], strides = [1, 1]} : vector<16x96xf32> to vector<8x8xf32>
    %50 = vector.extract_strided_slice %37 {offsets = [8, 0], sizes = [8, 8], strides = [1, 1]} : vector<16x96xf32> to vector<8x8xf32>
    %51 = vector.extract_strided_slice %37 {offsets = [8, 32], sizes = [8, 8], strides = [1, 1]} : vector<16x96xf32> to vector<8x8xf32>
    %52 = vector.extract_strided_slice %37 {offsets = [8, 64], sizes = [8, 8], strides = [1, 1]} : vector<16x96xf32> to vector<8x8xf32>
    %53 = vector.extract_strided_slice %37 {offsets = [8, 8], sizes = [8, 8], strides = [1, 1]} : vector<16x96xf32> to vector<8x8xf32>
    %54 = vector.extract_strided_slice %37 {offsets = [8, 40], sizes = [8, 8], strides = [1, 1]} : vector<16x96xf32> to vector<8x8xf32>
    %55 = vector.extract_strided_slice %37 {offsets = [8, 72], sizes = [8, 8], strides = [1, 1]} : vector<16x96xf32> to vector<8x8xf32>
    %56 = vector.extract_strided_slice %37 {offsets = [8, 16], sizes = [8, 8], strides = [1, 1]} : vector<16x96xf32> to vector<8x8xf32>
    %57 = vector.extract_strided_slice %37 {offsets = [8, 48], sizes = [8, 8], strides = [1, 1]} : vector<16x96xf32> to vector<8x8xf32>
    %58 = vector.extract_strided_slice %37 {offsets = [8, 80], sizes = [8, 8], strides = [1, 1]} : vector<16x96xf32> to vector<8x8xf32>
    %59 = vector.extract_strided_slice %37 {offsets = [8, 24], sizes = [8, 8], strides = [1, 1]} : vector<16x96xf32> to vector<8x8xf32>
    %60 = vector.extract_strided_slice %37 {offsets = [8, 56], sizes = [8, 8], strides = [1, 1]} : vector<16x96xf32> to vector<8x8xf32>
    %61 = vector.extract_strided_slice %37 {offsets = [8, 88], sizes = [8, 8], strides = [1, 1]} : vector<16x96xf32> to vector<8x8xf32>
    %62 = vector.shape_cast %38 : vector<8x8xf32> to vector<1x8x8xf32>
    %63 = vector.shape_cast %41 : vector<8x8xf32> to vector<1x8x8xf32>
    %64 = vector.shape_cast %44 : vector<8x8xf32> to vector<1x8x8xf32>
    %65 = vector.shape_cast %47 : vector<8x8xf32> to vector<1x8x8xf32>
    %66 = vector.shape_cast %50 : vector<8x8xf32> to vector<1x8x8xf32>
    %67 = vector.shape_cast %53 : vector<8x8xf32> to vector<1x8x8xf32>
    %68 = vector.shape_cast %56 : vector<8x8xf32> to vector<1x8x8xf32>
    %69 = vector.shape_cast %59 : vector<8x8xf32> to vector<1x8x8xf32>
    %70 = tpu.concatenate %62, %63, %64, %65, %66, %67, %68, %69 in 0 : vector<1x8x8xf32>, vector<1x8x8xf32>, vector<1x8x8xf32>, vector<1x8x8xf32>, vector<1x8x8xf32>, vector<1x8x8xf32>, vector<1x8x8xf32>, vector<1x8x8xf32> -> vector<8x8x8xf32>
    %cst_23 = arith.constant 0.353553385 : f32
    %71 = vector.broadcast %cst_23 : f32 to vector<8x8x8xf32>
    %72 = arith.mulf %70, %71 : vector<8x8x8xf32>
    %73 = vector.shape_cast %39 : vector<8x8xf32> to vector<1x8x8xf32>
    %74 = vector.shape_cast %42 : vector<8x8xf32> to vector<1x8x8xf32>
    %75 = vector.shape_cast %45 : vector<8x8xf32> to vector<1x8x8xf32>
    %76 = vector.shape_cast %48 : vector<8x8xf32> to vector<1x8x8xf32>
    %77 = vector.shape_cast %51 : vector<8x8xf32> to vector<1x8x8xf32>
    %78 = vector.shape_cast %54 : vector<8x8xf32> to vector<1x8x8xf32>
    %79 = vector.shape_cast %57 : vector<8x8xf32> to vector<1x8x8xf32>
    %80 = vector.shape_cast %60 : vector<8x8xf32> to vector<1x8x8xf32>
    %81 = tpu.concatenate %73, %74, %75, %76, %77, %78, %79, %80 in 0 : vector<1x8x8xf32>, vector<1x8x8xf32>, vector<1x8x8xf32>, vector<1x8x8xf32>, vector<1x8x8xf32>, vector<1x8x8xf32>, vector<1x8x8xf32>, vector<1x8x8xf32> -> vector<8x8x8xf32>
    %82 = vector.shape_cast %40 : vector<8x8xf32> to vector<1x8x8xf32>
    %83 = vector.shape_cast %43 : vector<8x8xf32> to vector<1x8x8xf32>
    %84 = vector.shape_cast %46 : vector<8x8xf32> to vector<1x8x8xf32>
    %85 = vector.shape_cast %49 : vector<8x8xf32> to vector<1x8x8xf32>
    %86 = vector.shape_cast %52 : vector<8x8xf32> to vector<1x8x8xf32>
    %87 = vector.shape_cast %55 : vector<8x8xf32> to vector<1x8x8xf32>
    %88 = vector.shape_cast %58 : vector<8x8xf32> to vector<1x8x8xf32>
    %89 = vector.shape_cast %61 : vector<8x8xf32> to vector<1x8x8xf32>
    %90 = tpu.concatenate %82, %83, %84, %85, %86, %87, %88, %89 in 0 : vector<1x8x8xf32>, vector<1x8x8xf32>, vector<1x8x8xf32>, vector<1x8x8xf32>, vector<1x8x8xf32>, vector<1x8x8xf32>, vector<1x8x8xf32>, vector<1x8x8xf32> -> vector<8x8x8xf32>
    "tpu.trace_start"() <{level = 10 : i32, message = "nqd,nkd->nqk"}> : () -> ()
    %cst_24 = arith.constant dense<0.000000e+00> : vector<8x8x8xf32>
    %91 = tpu.matmul %72, %81, %cst_24 {dimension_numbers = #tpu.dot_dimension_numbers<[2], [2], [1], [1], [0, 0, 0, 1, 1, 1], [0], [0]>} : vector<8x8x8xf32>, vector<8x8x8xf32>, vector<8x8x8xf32> -> vector<8x8x8xf32>
    "tpu.trace_stop"() : () -> ()
    %92 = arith.mulf %91, %1 : vector<8x8x8xf32>
    %cst_25 = arith.constant 1.000000e+00 : f32
    %93 = vector.broadcast %cst_25 : f32 to vector<8x8x8xf32>
    %94 = arith.subf %1, %93 : vector<8x8x8xf32>
    %cst_26 = arith.constant 1.000000e+09 : f32
    %95 = vector.broadcast %cst_26 : f32 to vector<8x8x8xf32>
    %96 = arith.mulf %94, %95 : vector<8x8x8xf32>
    %97 = arith.addf %92, %96 : vector<8x8x8xf32>
    %cst_27 = arith.constant dense<0xFF800000> : vector<8x8xf32>
    %98 = vector.multi_reduction <maximumf>, %97, %cst_27 [2] : vector<8x8x8xf32> to vector<8x8xf32>
    %99 = vector.shape_cast %98 : vector<8x8xf32> to vector<8x8x1xf32>
    %100 = vector.broadcast %99 : vector<8x8x1xf32> to vector<8x8x8xf32>
    %101 = arith.subf %97, %100 : vector<8x8x8xf32>
    %102 = math.exp %101 : vector<8x8x8xf32>
    %cst_28 = arith.constant dense<0.000000e+00> : vector<8x8xf32>
    %103 = vector.multi_reduction <add>, %102, %cst_28 [2] : vector<8x8x8xf32> to vector<8x8xf32>
    %104 = vector.shape_cast %103 : vector<8x8xf32> to vector<8x8x1xf32>
    %105 = tpu.reciprocal %104 {approx = true} : vector<8x8x1xf32> -> vector<8x8x1xf32>
    %106 = vector.broadcast %105 : vector<8x8x1xf32> to vector<8x8x8xf32>
    %107 = arith.mulf %102, %106 : vector<8x8x8xf32>
    "tpu.trace_start"() <{level = 10 : i32, message = "nqk,nkd->nqd"}> : () -> ()
    %cst_29 = arith.constant dense<0.000000e+00> : vector<8x8x8xf32>
    %108 = tpu.matmul %107, %90, %cst_29 {dimension_numbers = #tpu.dot_dimension_numbers<[2], [1], [1], [2], [0, 0, 0, 1, 1, 2], [0], [0]>} : vector<8x8x8xf32>, vector<8x8x8xf32>, vector<8x8x8xf32> -> vector<8x8x8xf32>
    "tpu.trace_stop"() : () -> ()
    %109 = vector.extract_strided_slice %108 {offsets = [0, 0, 0], sizes = [1, 8, 8], strides = [1, 1, 1]} : vector<8x8x8xf32> to vector<1x8x8xf32>
    %110 = vector.shape_cast %109 : vector<1x8x8xf32> to vector<8x8xf32>
    %111 = vector.extract_strided_slice %108 {offsets = [1, 0, 0], sizes = [1, 8, 8], strides = [1, 1, 1]} : vector<8x8x8xf32> to vector<1x8x8xf32>
    %112 = vector.shape_cast %111 : vector<1x8x8xf32> to vector<8x8xf32>
    %113 = vector.extract_strided_slice %108 {offsets = [2, 0, 0], sizes = [1, 8, 8], strides = [1, 1, 1]} : vector<8x8x8xf32> to vector<1x8x8xf32>
    %114 = vector.shape_cast %113 : vector<1x8x8xf32> to vector<8x8xf32>
    %115 = vector.extract_strided_slice %108 {offsets = [3, 0, 0], sizes = [1, 8, 8], strides = [1, 1, 1]} : vector<8x8x8xf32> to vector<1x8x8xf32>
    %116 = vector.shape_cast %115 : vector<1x8x8xf32> to vector<8x8xf32>
    %117 = tpu.concatenate %110, %112, %114, %116 in 1 : vector<8x8xf32>, vector<8x8xf32>, vector<8x8xf32>, vector<8x8xf32> -> vector<8x32xf32>
    %118 = vector.extract_strided_slice %108 {offsets = [4, 0, 0], sizes = [1, 8, 8], strides = [1, 1, 1]} : vector<8x8x8xf32> to vector<1x8x8xf32>
    %119 = vector.shape_cast %118 : vector<1x8x8xf32> to vector<8x8xf32>
    %120 = vector.extract_strided_slice %108 {offsets = [5, 0, 0], sizes = [1, 8, 8], strides = [1, 1, 1]} : vector<8x8x8xf32> to vector<1x8x8xf32>
    %121 = vector.shape_cast %120 : vector<1x8x8xf32> to vector<8x8xf32>
    %122 = vector.extract_strided_slice %108 {offsets = [6, 0, 0], sizes = [1, 8, 8], strides = [1, 1, 1]} : vector<8x8x8xf32> to vector<1x8x8xf32>
    %123 = vector.shape_cast %122 : vector<1x8x8xf32> to vector<8x8xf32>
    %124 = vector.extract_strided_slice %108 {offsets = [7, 0, 0], sizes = [1, 8, 8], strides = [1, 1, 1]} : vector<8x8x8xf32> to vector<1x8x8xf32>
    %125 = vector.shape_cast %124 : vector<1x8x8xf32> to vector<8x8xf32>
    %126 = tpu.concatenate %119, %121, %123, %125 in 1 : vector<8x8xf32>, vector<8x8xf32>, vector<8x8xf32>, vector<8x8xf32> -> vector<8x32xf32>
    %127 = tpu.concatenate %117, %126 in 0 : vector<8x32xf32>, vector<8x32xf32> -> vector<16x32xf32>
    %cst_30 = arith.constant dense<0.000000e+00> : vector<16x32xf32>
    %128 = tpu.matmul %127, %2, %cst_30 {dimension_numbers = #tpu.dot_dimension_numbers<[1], [0], [0], [1], [0, 0, 1, 1], [], []>} : vector<16x32xf32>, vector<32x32xf32>, vector<16x32xf32> -> vector<16x32xf32>
    %129 = arith.addf %0, %128 : vector<16x32xf32>
    %130 = vector.broadcast %8 : vector<1x32xf32> to vector<16x32xf32>
    %131 = arith.addf %129, %130 : vector<16x32xf32>
    %cst_31 = arith.constant dense<0.000000e+00> : vector<16xf32>
    %132 = vector.multi_reduction <add>, %131, %cst_31 [1] : vector<16x32xf32> to vector<16xf32>
    %133 = vector.shape_cast %132 : vector<16xf32> to vector<16x1xf32>
    %cst_32 = arith.constant 3.200000e+01 : f32
    %134 = vector.broadcast %cst_32 : f32 to vector<16x1xf32>
    %135 = arith.divf %133, %134 : vector<16x1xf32>
    %136 = vector.broadcast %135 : vector<16x1xf32> to vector<16x32xf32>
    %137 = arith.subf %131, %136 : vector<16x32xf32>
    %138 = arith.mulf %137, %137 : vector<16x32xf32>
    %cst_33 = arith.constant dense<0.000000e+00> : vector<16xf32>
    %139 = vector.multi_reduction <add>, %138, %cst_33 [1] : vector<16x32xf32> to vector<16xf32>
    %140 = vector.shape_cast %139 : vector<16xf32> to vector<16x1xf32>
    %cst_34 = arith.constant 3.100000e+01 : f32
    %141 = vector.broadcast %cst_34 : f32 to vector<16x1xf32>
    %142 = arith.divf %140, %141 : vector<16x1xf32>
    %143 = math.sqrt %142 : vector<16x1xf32>
    %144 = vector.broadcast %135 : vector<16x1xf32> to vector<16x32xf32>
    %145 = arith.subf %131, %144 : vector<16x32xf32>
    %146 = vector.broadcast %6 : vector<1x32xf32> to vector<16x32xf32>
    %147 = arith.mulf %146, %145 : vector<16x32xf32>
    %cst_35 = arith.constant 9.99999997E-7 : f32
    %148 = vector.broadcast %cst_35 : f32 to vector<16x1xf32>
    %149 = arith.addf %143, %148 : vector<16x1xf32>
    %150 = vector.broadcast %149 : vector<16x1xf32> to vector<16x32xf32>
    %151 = arith.divf %147, %150 : vector<16x32xf32>
    %152 = vector.broadcast %7 : vector<1x32xf32> to vector<16x32xf32>
    %153 = arith.addf %151, %152 : vector<16x32xf32>
    %c0_36 = arith.constant 0 : index
    %c0_37 = arith.constant 0 : index
    %154 = vector.load %arg4[%c0_36, %c0_37] : memref<32x128xf32, #tpu.memory_space<vmem>>, vector<32x128xf32>
    %cst_38 = arith.constant dense<0.000000e+00> : vector<16x128xf32>
    %155 = tpu.matmul %153, %154, %cst_38 {dimension_numbers = #tpu.dot_dimension_numbers<[1], [0], [0], [1], [0, 0, 1, 1], [], []>} : vector<16x32xf32>, vector<32x128xf32>, vector<16x128xf32> -> vector<16x128xf32>
    %156 = vector.broadcast %11 : vector<1x128xf32> to vector<16x128xf32>
    %157 = arith.addf %155, %156 : vector<16x128xf32>
    %cst_39 = arith.constant 5.000000e-01 : f32
    %158 = vector.broadcast %cst_39 : f32 to vector<16x128xf32>
    %159 = arith.mulf %158, %157 : vector<16x128xf32>
    %160 = arith.mulf %157, %157 : vector<16x128xf32>
    %161 = arith.mulf %157, %160 : vector<16x128xf32>
    %cst_40 = arith.constant 4.471500e-02 : f32
    %162 = vector.broadcast %cst_40 : f32 to vector<16x128xf32>
    %163 = arith.mulf %162, %161 : vector<16x128xf32>
    %164 = arith.addf %157, %163 : vector<16x128xf32>
    %cst_41 = arith.constant 0.797884583 : f32
    %165 = vector.broadcast %cst_41 : f32 to vector<16x128xf32>
    %166 = arith.mulf %165, %164 : vector<16x128xf32>
    %167 = math.tanh %166 : vector<16x128xf32>
    %cst_42 = arith.constant 1.000000e+00 : f32
    %168 = vector.broadcast %cst_42 : f32 to vector<16x128xf32>
    %169 = arith.addf %168, %167 : vector<16x128xf32>
    %170 = arith.mulf %159, %169 : vector<16x128xf32>
    %cst_43 = arith.constant dense<0.000000e+00> : vector<16x32xf32>
    %171 = tpu.matmul %170, %3, %cst_43 {dimension_numbers = #tpu.dot_dimension_numbers<[1], [0], [0], [1], [0, 0, 1, 1], [], []>} : vector<16x128xf32>, vector<128x32xf32>, vector<16x32xf32> -> vector<16x32xf32>
    %172 = vector.broadcast %9 : vector<1x32xf32> to vector<16x32xf32>
    %173 = arith.addf %171, %172 : vector<16x32xf32>
    %174 = arith.addf %131, %173 : vector<16x32xf32>
    %c0_44 = arith.constant 0 : index
    %c0_45 = arith.constant 0 : index
    %175 = vector.load %arg7[%c0_44, %c0_45] : memref<16x32xf32, #tpu.memory_space<vmem>>, vector<16x32xf32>
    tpu.vector_store %arg7[%c0_44, %c0_45], %174 {strides = array<i32>} : memref<16x32xf32, #tpu.memory_space<vmem>>, vector<16x32xf32>,
    return
  }
  func.func @transform_0(%arg0: i32) -> (i32, i32) {
    %c0_i32 = arith.constant 0 : i32
    %c0_i32_0 = arith.constant 0 : i32
    %c0_i32_1 = arith.constant 0 : i32
    return %c0_i32, %c0_i32_0 : i32, i32
  }
  func.func @transform_1(%arg0: i32) -> (i32, i32, i32) {
    %c0_i32 = arith.constant 0 : i32
    %c0_i32_0 = arith.constant 0 : i32
    %c0_i32_1 = arith.constant 0 : i32
    %c0_i32_2 = arith.constant 0 : i32
    return %c0_i32, %c0_i32_0, %c0_i32_1 : i32, i32, i32
  }
  func.func @transform_2(%arg0: i32) -> (i32, i32) {
    %c0_i32 = arith.constant 0 : i32
    %c0_i32_0 = arith.constant 0 : i32
    %c0_i32_1 = arith.constant 0 : i32
    return %c0_i32, %c0_i32_0 : i32, i32
  }
  func.func @transform_3(%arg0: i32) -> (i32, i32) {
    %c0_i32 = arith.constant 0 : i32
    %c0_i32_0 = arith.constant 0 : i32
    %c0_i32_1 = arith.constant 0 : i32
    return %c0_i32, %c0_i32_0 : i32, i32
  }
  func.func @transform_4(%arg0: i32) -> (i32, i32) {
    %c0_i32 = arith.constant 0 : i32
    %c0_i32_0 = arith.constant 0 : i32
    %c0_i32_1 = arith.constant 0 : i32
    return %c0_i32, %c0_i32_0 : i32, i32
  }
  func.func @transform_5(%arg0: i32) -> (i32, i32) {
    %c0_i32 = arith.constant 0 : i32
    %c0_i32_0 = arith.constant 0 : i32
    %c0_i32_1 = arith.constant 0 : i32
    return %c0_i32, %c0_i32_0 : i32, i32
  }
  func.func @transform_6(%arg0: i32) -> (i32, i32) {
    %c0_i32 = arith.constant 0 : i32
    %c0_i32_0 = arith.constant 0 : i32
    %c0_i32_1 = arith.constant 0 : i32
    return %c0_i32, %c0_i32_0 : i32, i32
  }
}

</mosaic_0001>

<bundles_post_ra>
// kernel: tpu_custom_call.1
= control target key start
LH: loop header
LB: loop body
LE: loop exit
PB: predicated region body
PF: predicated region fallthrough
CT: control target
= control target key end

     0   :  { %vm62_vm0 = vcmask 261120   ;;  %s2693_s0 = inlined_call_operand.vmem [shape: f32[16,32], index: 0, kind: input, shape index: {}]   ;;  %s2694_s1 = inlined_call_operand.vmem [shape: f32[8,8,8], index: 1, kind: input, shape index: {}]   ;;  %s2695_s2 = inlined_call_operand.vmem [shape: f32[32,96], index: 2, kind: input, shape index: {}]   ;;  %s2696_s3 = inlined_call_operand.vmem [shape: f32[32,128], index: 3, kind: input, shape index: {}]   ;;  %s2697_s4 = inlined_call_operand.vmem [shape: f32[168,32], index: 4, kind: input, shape index: {}]   ;;  %s2698_s5 = inlined_call_operand.vmem [shape: f32[2,128], index: 5, kind: input, shape index: {}]   ;;  %s2699_s6 = inlined_call_operand.hbm [shape: f32[16,32], index: 6, kind: output, shape index: {}]  }
   0x1   :  { %v2356_v0 = vld [vmem:[%s2693_s0] sm:$0xff]  ;;  %v2361_v1 = vld [vmem:[%s2693_s0 + $0x8] sm:$0xff] }
   0x2   :  { %v63_v2 = vsel %vm62_vm0, %v2356_v0, 0.0 }
   0x3   :  { %11 = vsyncpa [#allocation3], 0  ;;  %64 = vadd.xlane.f32.xlu0 %v63_v2  ;;  %v66_v3 = vsel %vm62_vm0, %v2361_v1, 0.0  ;;  %v120_v14 = vld [vmem:[%s2695_s2 + $0x18] sm:$0xff]  ;;  %v119_v15 = vld [vmem:[%s2695_s2 + $0x10] sm:$0xff]  ;;  %v2306_v44 = vmov 0.0  }
   0x4   :  { %2072 = vmatprep.subr.mxu1 %v120_v14  ;;  %v118_v16 = vld [vmem:[%s2695_s2 + $0x8] sm:$0xff]  ;;  %v117_v17 = vld [vmem:[%s2695_s2] sm:$0xff]  ;;  %2093 = vmatprep.subr.mxu0 %v2306_v44  ;;  %vm2307_vm5 = vmmov 0   ;;  %s2308_s13 = smov 112   ;;  %s2309_s14 = smov 120   ;;  %vm236_vm6 = vcmask 64512  }
   0x5   :  { %2073 = vmatpush3.msra.mxu1 %v120_v14  ;;  %v1958_v34 = vld [vmem:[%s2697_s4 + $0xa0] ss:$0 sm:$0xff]  ;;  %v1959_v37 = vld [vmem:[%s2697_s4 + $0xa1] ss:$0 sm:$0xff]  ;;  %2095 = vmatprep.mubr.msk.f32.mxu0 %vm2307_vm5, %v2306_v44  ;;  %s2310_s15 = smov 104   ;;  %s2311_s16 = smov 96  }
   0x6   :  { %2074 = vmatprep.subr.mxu1 %v119_v15  ;;  %v1960_v46 = vld [vmem:[%s2698_s5] ss:$0 sm:$0xff]  ;;  %s2315_s17 = smov 24   ;;  %vm1592_vm7 = vcmask 130048   ;;  %vm1594_vm8 = vcmask 195584   ;;  %s2316_s12 = smov [#allocation2]  }
   0x7   :  { %67 = vadd.xlane.f32.xlu0 %v66_v3  ;;  %2075 = vmatpush3.msra.mxu1 %v119_v15 }
   0x8   :  { %2076 = vmatprep.subr.mxu1 %v118_v16 }
   0x9   :  { %2077 = vmatpush3.msra.mxu1 %v118_v16 }
   0xa   :  { %2078 = vmatprep.subr.mxu1 %v117_v17 }
   0xb   :  { %2079 = vmatpush3.msra.mxu1 %v117_v17 }
   0xc   :  { %2083 = vmatprep.subr.mxu1 %v2306_v44 }
  0x8c   :  { %v65_v4 = vpop.xlane.xlu0 %64 }
  0x8d   :  { %v70_v5 = vmul.f32 0.03125, %v65_v4 }
  0x8f   :  { %v72_v6 = vsub.f32 %v2356_v0, %v70_v5 }
  0x90   :  { %v68_v7 = vpop.xlane.xlu0 %67 }
  0x91   :  { %v71_v8 = vmul.f32 0.03125, %v68_v7  ;;  %v74_v9 = vmul.f32 %v72_v6, %v72_v6  ;;  %v103_v35 = vmul.f32 %v1958_v34, %v72_v6 }
  0x93   :  { %v73_v10 = vsub.f32 %v2361_v1, %v71_v8  ;;  %v76_v11 = vsel %vm62_vm0, %v74_v9, 0.0 }
  0x94   :  { %77 = vadd.xlane.f32.xlu1 %v76_v11 }
  0x95   :  { %v75_v12 = vmul.f32 %v73_v10, %v73_v10  ;;  %v104_v39 = vmul.f32 %v1958_v34, %v73_v10  ;;  %v26_v10 = vld [vmem:[%s2694_s1] sm:$0xff] }
  0x96   :  { %v1979_v11 = vadd.f32 -1.0, %v26_v10 }
  0x97   :  { %v79_v13 = vsel %vm62_vm0, %v75_v12, 0.0 }
  0x98   :  { %80 = vadd.xlane.f32.xlu1 %v79_v13  ;;  %v867_v12 = vmul.f32 1e+09, %v1979_v11 }
 0x11d   :  { %v78_v18 = vpop.xlane.xlu1 %77 }
 0x11e   :  { %v83_v19 = vmul.f32 0.032258064, %v78_v18  ;;  %v27_v18 = vld [vmem:[%s2694_s1 + $0x8] sm:$0xff] }
 0x120   :  { %2232 = vrsqrt.f32 %v83_v19  ;;  %vm87_vm1 = vcmp.eq.f32.partialorder %v83_v19, inf  ;;  %v90_v24 = vand.u32 2147483648, %v83_v19  ;;  %vm89_vm2 = vcmp.eq.f32.partialorder %v83_v19, 0.0 }
 0x121   :  { %v81_v20 = vpop.xlane.xlu1 %80 }
 0x122   :  { %v84_v21 = vmul.f32 0.032258064, %v81_v20  ;;  %v1980_v20 = vadd.f32 -1.0, %v27_v18 }
 0x124   :  { %2234 = vrsqrt.f32 %v84_v21  ;;  %vm94_vm3 = vcmp.eq.f32.partialorder %v84_v21, inf  ;;  %v97_v30 = vand.u32 2147483648, %v84_v21  ;;  %vm96_vm4 = vcmp.eq.f32.partialorder %v84_v21, 0.0 }
 0x12d   :  { %v2233_v22 = vpop.eup %2232 }
 0x12e   :  { %v86_v23 = vmul.f32 %v2233_v22, %v83_v19  ;;  %v29_v22 = vld [vmem:[%s2694_s1 + $0x18] sm:$0xff] }
 0x130   :  { %v88_v25 = vsel %vm87_vm1, %v83_v19, %v86_v23  ;;  %v28_v19 = vld [vmem:[%s2694_s1 + $0x10] sm:$0xff]  ;;  %v30_v23 = vld [vmem:[%s2694_s1 + $0x20] sm:$0xff] }
 0x131   :  { %v2235_v26 = vpop.eup %2234  ;;  %v91_v27 = vsel %vm89_vm2, %v90_v24, %v88_v25  ;;  %v868_v24 = vmul.f32 1e+09, %v1980_v20 }
 0x132   :  { %v93_v28 = vmul.f32 %v2235_v26, %v84_v21  ;;  %v105_v29 = vadd.f32 1e-06, %v91_v27  ;;  %v1982_v26 = vadd.f32 -1.0, %v29_v22 }
 0x134   :  { %v95_v31 = vsel %vm94_vm3, %v84_v21, %v93_v28  ;;  %2236 = vrcp.f32 %v105_v29  ;;  %v1981_v21 = vadd.f32 -1.0, %v28_v19  ;;  %v1983_v29 = vadd.f32 -1.0, %v30_v23 }
 0x135   :  { %v98_v32 = vsel %vm96_vm4, %v97_v30, %v95_v31  ;;  %v31_v30 = vld [vmem:[%s2694_s1 + $0x28] sm:$0xff] }
 0x136   :  { %v106_v33 = vadd.f32 1e-06, %v98_v32  ;;  %v869_v25 = vmul.f32 1e+09, %v1981_v21 }
 0x138   :  { %2238 = vrcp.f32 %v106_v33  ;;  %v32_v33 = vld [vmem:[%s2694_s1 + $0x30] sm:$0xff] }
 0x141   :  { %v2237_v36 = vpop.eup %2236 }
 0x142   :  { %v108_v38 = vmul.f32 %v2237_v36, %v103_v35  ;;  %v870_v36 = vmul.f32 1e+09, %v1982_v26 }
 0x144   :  { %v115_v40 = vadd.f32 %v1959_v37, %v108_v38 }
 0x145   :  { %v2239_v41 = vpop.eup %2238 }
 0x146   :  { %v110_v42 = vmul.f32 %v2239_v41, %v104_v39  ;;  %2080 = vmatprep.mubr.msk.f32.mxu1 %vm62_vm0, %v115_v40  ;;  %v1984_v39 = vadd.f32 -1.0, %v31_v30 }
 0x148   :  { %v116_v43 = vadd.f32 %v1959_v37, %v110_v42  ;;  %v871_v42 = vmul.f32 1e+09, %v1983_v29 }
 0x14a   :  { %2081 = vmatmul.mubr.msk.f32.vlgmr.msra.gmra.mxu1 %vm62_vm0, %v116_v43  ;;  %v1985_v43 = vadd.f32 -1.0, %v32_v33 }
 0x14b   :  { %2085 = vmatprep.mubr.msk.f32.mxu1 %vm2307_vm5, %v2306_v44 }
 0x20a   :  { %v2082_v45 = vpop.f32.mrf.mxu1 }
 0x20b   :  { %v2404_v49 = vadd.f32 %v2082_v45, %v1960_v46  ;;  %v33_v45 = vld [vmem:[%s2694_s1 + $0x38] sm:$0xff]  ;;  %s2312_s1 = smov 64  }
 0x20c   :  { %v197_v47 = vpop.f32.mrf.mxu1 }
 0x20d   :  { %v2400_v48 = vadd.f32 %v1960_v46, %v197_v47  ;;  %v230_v3 = vmul.f32 0.35355338, %v2404_v49 }
 0x20f   :  { %210 = vrot.lane.b32.xlu1 %v2400_v48, %s2308_s13  ;;  %207 = vrot.lane.b32.xlu0 %v2400_v48, %s2309_s14  ;;  %v226_v56 = vmul.f32 0.35355338, %v2400_v48 }
 0x213   :  { %213 = vrot.lane.b32.xlu1 %v2400_v48, %s2310_s15  ;;  %220 = vrot.lane.b32.xlu0 %v2404_v49, %s2308_s13  ;;  %s2313_s13 = smov 16  }
 0x217   :  { %217 = vrot.lane.b32.xlu1 %v2404_v49, %s2309_s14  ;;  %234 = vrot.lane.b32.xlu0 %v2400_v48, %s2311_s16 }
 0x21b   :  { %223 = vrot.lane.b32.xlu1 %v2404_v49, %s2310_s15 }
 0x281   :  { %v2411_v50 = vpop.permute.xlu1 %210  ;;  %v2413_v51 = vpop.permute.xlu0 %207 }
 0x282   :  { %389 = vrot.lane.b32.xlu0 %v2411_v50, %s2311_s16  ;;  %312 = vrot.lane.b32.xlu1 %v2413_v51, %s2311_s16  ;;  %v228_v60 = vmul.f32 0.35355338, %v2411_v50  ;;  %v227_v61 = vmul.f32 0.35355338, %v2413_v51 }
 0x285   :  { %v2417_v52 = vpop.permute.xlu1 %213  ;;  %v2419_v53 = vpop.permute.xlu0 %220 }
 0x286   :  { %543 = vrot.lane.b32.xlu0 %v2404_v49, %s2311_s16  ;;  %466 = vrot.lane.b32.xlu1 %v2417_v52, %s2311_s16  ;;  %v229_v2 = vmul.f32 0.35355338, %v2417_v52  ;;  %v232_v6 = vmul.f32 0.35355338, %v2419_v53 }
 0x289   :  { %v2423_v54 = vpop.permute.xlu1 %217  ;;  %v235_v55 = vpop.permute.xlu0 %234 }
 0x28a   :  { %620 = vrot.lane.b32.xlu1 %v2423_v54, %s2311_s16  ;;  %697 = vrot.lane.b32.xlu0 %v2419_v53, %s2311_s16  ;;  %v231_v7 = vmul.f32 0.35355338, %v2423_v54 }
 0x28b   :  { %2084 = vmatpush3.xpose.msk.msra.mxu1 %vm236_vm6, %v235_v55 }
 0x28c   :  { %2088 = vmatprep.subr.mxu1 %v2306_v44 }
 0x28d   :  { %v2430_v57 = vpop.permute.xlu1 %223 }
 0x28e   :  { %2086 = vmatmul.mubr.msk.f32.vlgmr.msra.gmra.mxu1 %vm236_vm6, %v226_v56  ;;  %774 = vrot.lane.b32.xlu1 %v2430_v57, %s2311_s16  ;;  %v233_v9 = vmul.f32 0.35355338, %v2430_v57  ;;  %s2314_s16 = smov 8  }
 0x28f   :  { %2090 = vmatprep.mubr.msk.f32.mxu1 %vm2307_vm5, %v2306_v44 }
 0x2f4   :  { %v313_v58 = vpop.permute.xlu1 %312  ;;  %v390_v59 = vpop.permute.xlu0 %389 }
 0x2f5   :  { %2089 = vmatpush3.xpose.msk.msra.mxu1 %vm236_vm6, %v313_v58  ;;  %2094 = vmatpush3.xpose.msk.msra.mxu0 %vm236_vm6, %v390_v59 }
 0x2f6   :  { %2103 = vmatprep.subr.mxu0 %v2306_v44  ;;  %2098 = vmatprep.subr.mxu1 %v2306_v44 }
 0x2f8   :  { %v467_v62 = vpop.permute.xlu1 %466  ;;  %2096 = vmatmul.mubr.msk.f32.vlgmr.msra.gmra.mxu0 %vm236_vm6, %v228_v60  ;;  %v544_v63 = vpop.permute.xlu0 %543  ;;  %2091 = vmatmul.mubr.msk.f32.vlgmr.msra.gmra.mxu1 %vm236_vm6, %v227_v61  ;;  %v872_v60 = vmul.f32 1e+09, %v1984_v39 }
 0x2f9   :  { %2099 = vmatpush3.xpose.msk.msra.mxu1 %vm236_vm6, %v467_v62  ;;  %2104 = vmatpush3.xpose.msk.msra.mxu0 %vm236_vm6, %v544_v63  ;;  %v1986_v62 = vadd.f32 -1.0, %v33_v45 }
 0x2fa   :  { %2100 = vmatprep.mubr.msk.f32.mxu1 %vm2307_vm5, %v2306_v44  ;;  %2105 = vmatprep.mubr.msk.f32.mxu0 %vm2307_vm5, %v2306_v44 }
 0x2fb   :  { %2113 = vmatprep.subr.mxu0 %v2306_v44  ;;  %2108 = vmatprep.subr.mxu1 %v2306_v44 }
 0x2fc   :  { %v621_v4 = vpop.permute.xlu1 %620  ;;  %2106 = vmatmul.mubr.msk.f32.vlgmr.msra.gmra.mxu0 %vm236_vm6, %v230_v3  ;;  %v698_v5 = vpop.permute.xlu0 %697  ;;  %2101 = vmatmul.mubr.msk.f32.vlgmr.msra.gmra.mxu1 %vm236_vm6, %v229_v2  ;;  %v873_v3 = vmul.f32 1e+09, %v1985_v43 }
 0x2fd   :  { %2109 = vmatpush3.xpose.msk.msra.mxu1 %vm236_vm6, %v621_v4  ;;  %2114 = vmatpush3.xpose.msk.msra.mxu0 %vm236_vm6, %v698_v5 }
 0x2fe   :  { %2110 = vmatprep.mubr.msk.f32.mxu1 %vm2307_vm5, %v2306_v44  ;;  %2115 = vmatprep.mubr.msk.f32.mxu0 %vm2307_vm5, %v2306_v44 }
 0x2ff   :  { %2118 = vmatprep.subr.mxu1 %v2306_v44  ;;  %2123 = vmatprep.subr.mxu0 %v2306_v44 }
 0x300   :  { %v775_v8 = vpop.permute.xlu1 %774  ;;  %2111 = vmatmul.mubr.msk.f32.vlgmr.msra.gmra.mxu1 %vm236_vm6, %v231_v7  ;;  %2116 = vmatmul.mubr.msk.f32.vlgmr.msra.gmra.mxu0 %vm236_vm6, %v232_v6 }
 0x301   :  { %2119 = vmatpush3.xpose.msk.msra.mxu1 %vm236_vm6, %v775_v8  ;;  %2120 = vmatprep.mubr.msk.f32.mxu1 %vm2307_vm5, %v2306_v44 }
 0x302   :  { %2128 = vmatprep.subr.mxu1 %v2306_v44  ;;  %2125 = vmatprep.mubr.msk.f32.mxu0 %vm2307_vm5, %v2306_v44 }
 0x304   :  { %2121 = vmatmul.mubr.msk.f32.vlgmr.msra.gmra.mxu1 %vm236_vm6, %v233_v9 }
 0x305   :  { %2130 = vmatprep.mubr.msk.f32.mxu1 %vm2307_vm5, %v2306_v44 }
 0x34e   :  { %v308_v13 = vpop.f32.mrf.mxu1 }
 0x34f   :  { %v851_v14 = vmul.f32 %v308_v13, %v26_v10  ;;  %v874_v10 = vmul.f32 1e+09, %v1986_v62 }
 0x350   :  { %v2087_v15 = vpop.f32.mrf.mxu1 }
 0x351   :  { %v2481_v16 = vadd.f32 %v867_v12, %v851_v14 }
 0x353   :  { %v883_v17 = vsel %vm236_vm6, %v2481_v16, -inf }
 0x354   :  { %884 = vmax.xlane.f32.xlu0 %v883_v17 }
 0x3b8   :  { %v385_v27 = vpop.f32.mrf.mxu1  ;;  %v462_v28 = vpop.f32.mrf.mxu0 }
 0x3b9   :  { %v852_v31 = vmul.f32 %v385_v27, %v27_v18  ;;  %v853_v32 = vmul.f32 %v462_v28, %v28_v19 }
 0x3ba   :  { %v2092_v34 = vpop.f32.mrf.mxu1  ;;  %v2097_v35 = vpop.f32.mrf.mxu0 }
 0x3bb   :  { %v877_v37 = vadd.f32 %v869_v25, %v853_v32  ;;  %v876_v38 = vadd.f32 %v868_v24, %v852_v31 }
 0x3bc   :  { %v539_v40 = vpop.f32.mrf.mxu1  ;;  %v616_v41 = vpop.f32.mrf.mxu0 }
 0x3bd   :  { %v854_v46 = vmul.f32 %v539_v40, %v29_v22  ;;  %v855_v47 = vmul.f32 %v616_v41, %v30_v23  ;;  %v889_v55 = vsel %vm236_vm6, %v877_v37, -inf  ;;  %v886_v56 = vsel %vm236_vm6, %v876_v38, -inf }
 0x3be   :  { %v2107_v58 = vpop.f32.mrf.mxu0  ;;  %890 = vmax.xlane.f32.xlu0 %v889_v55  ;;  %887 = vmax.xlane.f32.xlu1 %v886_v56  ;;  %v2102_v59 = vpop.f32.mrf.mxu1 }
 0x3bf   :  { %v878_v61 = vadd.f32 %v870_v36, %v854_v46  ;;  %v879_v7 = vadd.f32 %v871_v42, %v855_v47 }
 0x3c0   :  { %v693_v63 = vpop.f32.mrf.mxu1  ;;  %v770_v2 = vpop.f32.mrf.mxu0 }
 0x3c1   :  { %v856_v4 = vmul.f32 %v693_v63, %v31_v30  ;;  %v857_v5 = vmul.f32 %v770_v2, %v32_v33  ;;  %v892_v6 = vsel %vm236_vm6, %v878_v61, -inf  ;;  %v895_v14 = vsel %vm236_vm6, %v879_v7, -inf }
 0x3c2   :  { %v2117_v8 = vpop.f32.mrf.mxu0  ;;  %893 = vmax.xlane.f32.xlu0 %v892_v6  ;;  %v2112_v9 = vpop.f32.mrf.mxu1 }
 0x3c3   :  { %v880_v11 = vadd.f32 %v872_v60, %v856_v4  ;;  %v881_v17 = vadd.f32 %v873_v3, %v857_v5 }
 0x3c4   :  { %v847_v12 = vpop.f32.mrf.mxu1 }
 0x3c5   :  { %v858_v13 = vmul.f32 %v847_v12, %v33_v45  ;;  %v898_v15 = vsel %vm236_vm6, %v880_v11, -inf  ;;  %v901_v20 = vsel %vm236_vm6, %v881_v17, -inf }
 0x3c6   :  { %896 = vmax.xlane.f32.xlu0 %v895_v14  ;;  %899 = vmax.xlane.f32.xlu1 %v898_v15  ;;  %v2122_v18 = vpop.f32.mrf.mxu1 }
 0x3c7   :  { %v882_v19 = vadd.f32 %v874_v10, %v858_v13 }
 0x3c9   :  { %v904_v21 = vsel %vm236_vm6, %v882_v19, -inf }
 0x3ca   :  { %902 = vmax.xlane.f32.xlu0 %v901_v20  ;;  %905 = vmax.xlane.f32.xlu1 %v904_v21 }
 0x3db   :  { %1047 = vrot.lane.b32.xlu1 %v2413_v51, %s2312_s1 }
 0x3dd   :  { %v885_v22 = vpop.xlane.xlu0 %884 }
 0x3de   :  { %v907_v23 = vsub.f32 %v2481_v16, %v885_v22 }
 0x3df   :  { %1123 = vrot.lane.b32.xlu1 %v2411_v50, %s2312_s1 }
 0x3e0   :  { %971 = vrot.lane.b32.xlu0 %v2400_v48, %s2312_s1  ;;  %v915_v24 = vmul.f32 1.442695, %v907_v23 }
 0x3e2   :  { %2240 = vpow2.f32 %v915_v24 }
 0x3e3   :  { %1199 = vrot.lane.b32.xlu1 %v2417_v52, %s2312_s1 }
 0x3e4   :  { %1275 = vrot.lane.b32.xlu0 %v2404_v49, %s2312_s1 }
 0x3e7   :  { %1351 = vrot.lane.b32.xlu1 %v2423_v54, %s2312_s1 }
 0x3ef   :  { %v2526_v51 = vpop.eup %2240 }
 0x3f0   :  { %v931_v50 = vsel %vm236_vm6, %v2526_v51, 0.0 }
 0x403   :  { %932 = vadd.xlane.f32.xlu0 %v931_v50 }
 0x447   :  { %v891_v48 = vpop.xlane.xlu0 %890  ;;  %v888_v25 = vpop.xlane.xlu1 %887 }
 0x448   :  { %v909_v52 = vsub.f32 %v877_v37, %v891_v48  ;;  %v908_v26 = vsub.f32 %v876_v38, %v888_v25 }
 0x44a   :  { %v919_v27 = vmul.f32 1.442695, %v909_v52  ;;  %v917_v49 = vmul.f32 1.442695, %v908_v26 }
 0x44b   :  { %v894_v28 = vpop.xlane.xlu0 %893 }
 0x44c   :  { %2242 = vpow2.f32 %v919_v27  ;;  %v910_v29 = vsub.f32 %v878_v61, %v894_v28 }
 0x44d   :  { %2244 = vpow2.f32 %v917_v49 }
 0x44e   :  { %v921_v54 = vmul.f32 1.442695, %v910_v29 }
 0x44f   :  { %v897_v16 = vpop.xlane.xlu0 %896  ;;  %v900_v30 = vpop.xlane.xlu1 %899 }
 0x450   :  { %2246 = vpow2.f32 %v921_v54  ;;  %v911_v31 = vsub.f32 %v879_v7, %v897_v16  ;;  %v912_v32 = vsub.f32 %v880_v11, %v900_v30  ;;  %v37_v54 = vld [vmem:[%s2697_s4 + $0x18] sm:$0xff]  ;;  %v36_v16 = vld [vmem:[%s2697_s4 + $0x10] sm:$0xff] }
 0x452   :  { %v923_v33 = vmul.f32 1.442695, %v911_v31  ;;  %v925_v34 = vmul.f32 1.442695, %v912_v32  ;;  %v34_v32 = vld [vmem:[%s2697_s4] sm:$0xff] }
 0x453   :  { %v903_v35 = vpop.xlane.xlu0 %902  ;;  %v906_v36 = vpop.xlane.xlu1 %905 }
 0x454   :  { %2248 = vpow2.f32 %v923_v33  ;;  %v913_v39 = vsub.f32 %v881_v17, %v903_v35  ;;  %v914_v37 = vsub.f32 %v882_v19, %v906_v36 }
 0x455   :  { %2250 = vpow2.f32 %v925_v34 }
 0x456   :  { %v927_v38 = vmul.f32 1.442695, %v913_v39  ;;  %v929_v40 = vmul.f32 1.442695, %v914_v37 }
 0x457   :  { %v972_v41 = vpop.permute.xlu0 %971  ;;  %v1048_v42 = vpop.permute.xlu1 %1047 }
 0x458   :  { %2252 = vpow2.f32 %v927_v38  ;;  %2124 = vmatpush3.msra.mxu0 %v972_v41  ;;  %2129 = vmatpush3.msra.mxu1 %v1048_v42 }
 0x459   :  { %v2243_v43 = vpop.eup %2242  ;;  %2254 = vpow2.f32 %v929_v40  ;;  %2133 = vmatprep.subr.mxu0 %v2306_v44  ;;  %2138 = vmatprep.subr.mxu1 %v2306_v44 }
 0x45a   :  { %v2245_v45 = vpop.eup %2244  ;;  %v937_v46 = vsel %vm236_vm6, %v2243_v43, 0.0 }
 0x45b   :  { %938 = vadd.xlane.f32.xlu0 %v937_v46  ;;  %v934_v47 = vsel %vm236_vm6, %v2245_v45, 0.0  ;;  %v1276_v4 = vpop.permute.xlu0 %1275  ;;  %v1124_v8 = vpop.permute.xlu1 %1123 }
 0x45c   :  { %935 = vadd.xlane.f32.xlu1 %v934_v47 }
 0x45d   :  { %v2247_v55 = vpop.eup %2246 }
 0x45e   :  { %v940_v56 = vsel %vm236_vm6, %v2247_v55, 0.0 }
 0x45f   :  { %v1200_v9 = vpop.permute.xlu1 %1199 }
 0x460   :  { %941 = vadd.xlane.f32.xlu1 %v940_v56 }
 0x461   :  { %v2249_v58 = vpop.eup %2248 }
 0x462   :  { %v2251_v59 = vpop.eup %2250  ;;  %v943_v60 = vsel %vm236_vm6, %v2249_v58, 0.0 }
 0x463   :  { %944 = vadd.xlane.f32.xlu0 %v943_v60  ;;  %v946_v61 = vsel %vm236_vm6, %v2251_v59, 0.0 }
 0x464   :  { %947 = vadd.xlane.f32.xlu1 %v946_v61 }
 0x465   :  { %v2537_v62 = vpop.eup %2252 }
 0x466   :  { %v2539_v63 = vpop.eup %2254  ;;  %v949_v2 = vsel %vm236_vm6, %v2537_v62, 0.0 }
 0x467   :  { %950 = vadd.xlane.f32.xlu0 %v949_v2  ;;  %v952_v3 = vsel %vm236_vm6, %v2539_v63, 0.0 }
 0x468   :  { %953 = vadd.xlane.f32.xlu1 %v952_v3 }
 0x479   :  { %1503 = vrot.lane.b32.xlu1 %v2430_v57, %s2312_s1  ;;  %v1352_v57 = vpop.permute.xlu1 %1351 }
 0x47d   :  { %1427 = vrot.lane.b32.xlu0 %v2419_v53, %s2312_s1 }
 0x48c   :  { %v933_v5 = vpop.xlane.xlu0 %932 }
 0x48d   :  { %2256 = vrcp.f32 %v933_v5 }
 0x49a   :  { %v2257_v6 = vpop.eup %2256 }
 0x49b   :  { %v963_v7 = vmul.f32 %v2257_v6, %v2526_v51 }
 0x49d   :  { %2126 = vmatmul.mubr.msk.f32.vlgmr.msra.gmra.mxu0 %vm236_vm6, %v963_v7 }
 0x49e   :  { %2134 = vmatpush3.msra.mxu0 %v1124_v8  ;;  %2135 = vmatprep.mubr.msk.f32.mxu0 %vm2307_vm5, %v2306_v44 }
 0x49f   :  { %2143 = vmatprep.subr.mxu0 %v2306_v44 }
 0x4e4   :  { %v939_v10 = vpop.xlane.xlu0 %938 }
 0x4e5   :  { %2258 = vrcp.f32 %v939_v10  ;;  %v936_v53 = vpop.xlane.xlu1 %935 }
 0x4e6   :  { %2260 = vrcp.f32 %v936_v53 }
 0x4e9   :  { %v942_v11 = vpop.xlane.xlu1 %941 }
 0x4ea   :  { %2262 = vrcp.f32 %v942_v11 }
 0x4ec   :  { %v945_v12 = vpop.xlane.xlu0 %944 }
 0x4ed   :  { %2264 = vrcp.f32 %v945_v12  ;;  %v948_v13 = vpop.xlane.xlu1 %947 }
 0x4ee   :  { %2266 = vrcp.f32 %v948_v13 }
 0x4f0   :  { %v951_v14 = vpop.xlane.xlu0 %950 }
 0x4f1   :  { %2268 = vrcp.f32 %v951_v14  ;;  %v954_v15 = vpop.xlane.xlu1 %953 }
 0x4f2   :  { %v2259_v17 = vpop.eup %2258  ;;  %2270 = vrcp.f32 %v954_v15 }
 0x4f3   :  { %v2261_v18 = vpop.eup %2260  ;;  %v965_v19 = vmul.f32 %v2259_v17, %v2243_v43 }
 0x4f4   :  { %v964_v20 = vmul.f32 %v2261_v18, %v2245_v45  ;;  %v1428_v48 = vpop.permute.xlu0 %1427 }
 0x4f5   :  { %2136 = vmatmul.mubr.msk.f32.vlgmr.msra.gmra.mxu0 %vm236_vm6, %v965_v19  ;;  %v1504_v52 = vpop.permute.xlu1 %1503 }
 0x4f6   :  { %2131 = vmatmul.mubr.msk.f32.vlgmr.msra.gmra.mxu1 %vm236_vm6, %v964_v20  ;;  %2144 = vmatpush3.msra.mxu0 %v1276_v4  ;;  %v1997_v4 = vld [vmem:[%s2697_s4 + $0xa4] ss:$0 sm:$0xff]  ;;  %v1755_v20 = vld [vmem:[%s2696_s3 + $0x18] sm:$0xff] }
 0x4f7   :  { %v2263_v21 = vpop.eup %2262  ;;  %2139 = vmatpush3.msra.mxu1 %v1200_v9  ;;  %2140 = vmatprep.mubr.msk.f32.mxu1 %vm2307_vm5, %v2306_v44 }
 0x4f8   :  { %2148 = vmatprep.subr.mxu1 %v2306_v44  ;;  %v966_v22 = vmul.f32 %v2263_v21, %v2247_v55  ;;  %2145 = vmatprep.mubr.msk.f32.mxu0 %vm2307_vm5, %v2306_v44  ;;  %v1754_v21 = vld [vmem:[%s2696_s3 + $0x10] sm:$0xff] }
 0x4f9   :  { %2153 = vmatprep.subr.mxu0 %v2306_v44 }
 0x4fa   :  { %v2265_v23 = vpop.eup %2264  ;;  %2141 = vmatmul.mubr.msk.f32.vlgmr.msra.gmra.mxu1 %vm236_vm6, %v966_v22  ;;  %v1753_v22 = vld [vmem:[%s2696_s3 + $0x8] sm:$0xff] }
 0x4fb   :  { %v2267_v24 = vpop.eup %2266  ;;  %2149 = vmatpush3.msra.mxu1 %v1352_v57  ;;  %2150 = vmatprep.mubr.msk.f32.mxu1 %vm2307_vm5, %v2306_v44  ;;  %v967_v51 = vmul.f32 %v2265_v23, %v2249_v58  ;;  %v1752_v23 = vld [vmem:[%s2696_s3] sm:$0xff] }
 0x4fc   :  { %2158 = vmatprep.subr.mxu1 %v2306_v44  ;;  %v968_v50 = vmul.f32 %v2267_v24, %v2251_v59 }
 0x4fd   :  { %2146 = vmatmul.mubr.msk.f32.vlgmr.msra.gmra.mxu0 %vm236_vm6, %v967_v51 }
 0x4fe   :  { %v2269_v25 = vpop.eup %2268  ;;  %2151 = vmatmul.mubr.msk.f32.vlgmr.msra.gmra.mxu1 %vm236_vm6, %v968_v50  ;;  %2154 = vmatpush3.msra.mxu0 %v1428_v48 }
 0x4ff   :  { %v2271_v26 = vpop.eup %2270  ;;  %2159 = vmatpush3.msra.mxu1 %v1504_v52  ;;  %2155 = vmatprep.mubr.msk.f32.mxu0 %vm2307_vm5, %v2306_v44  ;;  %v969_v27 = vmul.f32 %v2269_v25, %v2537_v62 }
 0x500   :  { %2160 = vmatprep.mubr.msk.f32.mxu1 %vm2307_vm5, %v2306_v44  ;;  %v970_v49 = vmul.f32 %v2271_v26, %v2539_v63  ;;  %2163 = vmatprep.subr.mxu1 %v37_v54  ;;  %v35_v44 = vld [vmem:[%s2697_s4 + $0x8] sm:$0xff] }
 0x501   :  { %2156 = vmatmul.mubr.msk.f32.vlgmr.msra.gmra.mxu0 %vm236_vm6, %v969_v27 }
 0x502   :  { %2161 = vmatmul.mubr.msk.f32.vlgmr.msra.gmra.mxu1 %vm236_vm6, %v970_v49 }
 0x503   :  { %2164 = vmatpush3.msra.mxu1 %v37_v54 }
 0x504   :  { %2165 = vmatprep.subr.mxu1 %v36_v16 }
 0x505   :  { %2166 = vmatpush3.msra.mxu1 %v36_v16 }
 0x506   :  { %2167 = vmatprep.subr.mxu1 %v35_v44 }
 0x507   :  { %2168 = vmatpush3.msra.mxu1 %v35_v44 }
 0x508   :  { %2169 = vmatprep.subr.mxu1 %v34_v32 }
 0x509   :  { %2170 = vmatpush3.msra.mxu1 %v34_v32  ;;  %v1998_v32 = vld [vmem:[%s2697_s4 + $0xa2] ss:$0 sm:$0xff] }
 0x50a   :  { %2174 = vmatprep.subr.mxu1 %v1755_v20 }
 0x55d   :  { %v1043_v28 = vpop.f32.mrf.mxu0 }
 0x55f   :  { %v2127_v29 = vpop.f32.mrf.mxu0 }
 0x5b5   :  { %v1195_v30 = vpop.f32.mrf.mxu0 }
 0x5b6   :  { %v1119_v31 = vpop.f32.mrf.mxu1  ;;  %1584 = vrot.lane.b32.xlu1 %v1195_v30, %s2313_s13 }
 0x5b7   :  { %1580 = vrot.lane.b32.xlu0 %v1119_v31, %s2314_s16  ;;  %v2137_v33 = vpop.f32.mrf.mxu0 }
 0x5b8   :  { %v2132_v34 = vpop.f32.mrf.mxu1 }
 0x5ba   :  { %v1271_v35 = vpop.f32.mrf.mxu1 }
 0x5bb   :  { %1588 = vrot.lane.b32.xlu1 %v1271_v35, %s2315_s17  ;;  %v1999_v35 = vld [vmem:[%s2697_s4 + $0xa3] ss:$0 sm:$0xff] }
 0x5bc   :  { %v2142_v36 = vpop.f32.mrf.mxu1 }
 0x5bd   :  { %v1347_v39 = vpop.f32.mrf.mxu0 }
 0x5be   :  { %v1423_v37 = vpop.f32.mrf.mxu1 }
 0x5bf   :  { %1597 = vrot.lane.b32.xlu0 %v1423_v37, %s2314_s16  ;;  %v2147_v38 = vpop.f32.mrf.mxu0 }
 0x5c0   :  { %v2152_v40 = vpop.f32.mrf.mxu1 }
 0x5c1   :  { %v1499_v41 = vpop.f32.mrf.mxu0 }
 0x5c2   :  { %v1575_v42 = vpop.f32.mrf.mxu1 }
 0x5c3   :  { %1601 = vrot.lane.b32.xlu0 %v1499_v41, %s2313_s13  ;;  %1605 = vrot.lane.b32.xlu1 %v1575_v42, %s2315_s17  ;;  %v2157_v43 = vpop.f32.mrf.mxu0  ;;  %v53_v42 = vld [vmem:[%s2697_s4 + $0x98] sm:$0xff]  ;;  %s1947_s13 = sshll.u32 %s2316_s12, 4  ;;  %s1948_s13 = int_to_ptr.vmem [resolvable:$true] %s1947_s13 }
 0x5c4   :  { %v2162_v45 = vpop.f32.mrf.mxu1  ;;  %2185 = vmatprep.subr.mxu0 %v53_v42  ;;  %v52_v43 = vld [vmem:[%s2697_s4 + $0x90] sm:$0xff]  ;;  %s2284_s14 = scalar_lea.vmem %s1948_s13, 256  ;;  %p2289_p1 = scmp.lt.s32.totalorder %s1948_s13, %s1948_s13 }
 0x5c5   :  { %2186 = vmatpush3.msra.mxu0 %v53_v42  ;;  %v51_v45 = vld [vmem:[%s2697_s4 + $0x88] sm:$0xff]  ;;  %p2285_p0 = scmp.ne.s32.totalorder %s1948_s13, %s2284_s14  ;;  %p2290_p2 = scmp.lt.s32.totalorder %s2284_s14, %s2284_s14 }
 0x5c6   :  { %2187 = vmatprep.subr.mxu0 %v52_v43 }
 0x5c7   :  { %2188 = vmatpush3.msra.mxu0 %v52_v43  ;;  %p2291_p3 = por %p2290_p2, %p2289_p1 }
 0x5c8   :  { %2189 = vmatprep.subr.mxu0 %v51_v45 }
 0x5c9   :  { %2190 = vmatpush3.msra.mxu0 %v51_v45  ;;  %p2292_p4 = pnand %p2291_p3, %p2285_p0 }
 0x628   :  { %v1585_v46 = vpop.permute.xlu1 %1584 }
 0x629   :  { %v1581_v47 = vpop.permute.xlu0 %1580 }
 0x62a   :  { %v1591_v55 = vsel %vm236_vm6, %v1043_v28, %v1581_v47  ;;  %v49_v47 = vld [vmem:[%s2697_s4 + $0x78] sm:$0xff] }
 0x62b   :  { %v1593_v56 = vsel %vm1592_vm7, %v1591_v55, %v1585_v46  ;;  %v50_v46 = vld [vmem:[%s2697_s4 + $0x80] sm:$0xff]  ;;  %v48_v55 = vld [vmem:[%s2697_s4 + $0x70] sm:$0xff] }
 0x62c   :  { %2191 = vmatprep.subr.mxu0 %v50_v46 }
 0x62d   :  { %v1589_v58 = vpop.permute.xlu1 %1588  ;;  %2192 = vmatpush3.msra.mxu0 %v50_v46 }
 0x62e   :  { %v1595_v59 = vsel %vm1594_vm8, %v1593_v56, %v1589_v58  ;;  %2193 = vmatprep.subr.mxu0 %v49_v47  ;;  %v47_v56 = vld [vmem:[%s2697_s4 + $0x68] sm:$0xff]  ;;  %v46_v58 = vld [vmem:[%s2697_s4 + $0x60] sm:$0xff] }
 0x62f   :  { %2171 = vmatprep.mubr.msk.f32.mxu1 %vm62_vm0, %v1595_v59  ;;  %2194 = vmatpush3.msra.mxu0 %v49_v47  ;;  %v45_v59 = vld [vmem:[%s2697_s4 + $0x58] sm:$0xff] }
 0x630   :  { %2195 = vmatprep.subr.mxu0 %v48_v55 }
 0x631   :  { %v1598_v60 = vpop.permute.xlu0 %1597  ;;  %2196 = vmatpush3.msra.mxu0 %v48_v55 }
 0x632   :  { %v1608_v61 = vsel %vm236_vm6, %v1347_v39, %v1598_v60  ;;  %2197 = vmatprep.subr.mxu0 %v47_v56  ;;  %v44_v60 = vld [vmem:[%s2697_s4 + $0x50] sm:$0xff] }
 0x633   :  { %2198 = vmatpush3.msra.mxu0 %v47_v56 }
 0x634   :  { %2199 = vmatprep.subr.mxu0 %v46_v58 }
 0x635   :  { %v1602_v62 = vpop.permute.xlu0 %1601  ;;  %v1606_v63 = vpop.permute.xlu1 %1605  ;;  %2200 = vmatpush3.msra.mxu0 %v46_v58 }
 0x636   :  { %v1609_v2 = vsel %vm1592_vm7, %v1608_v61, %v1602_v62  ;;  %2201 = vmatprep.subr.mxu0 %v45_v59  ;;  %v43_v61 = vld [vmem:[%s2697_s4 + $0x48] sm:$0xff]  ;;  %v42_v62 = vld [vmem:[%s2697_s4 + $0x40] sm:$0xff] }
 0x637   :  { %v1610_v3 = vsel %vm1594_vm8, %v1609_v2, %v1606_v63  ;;  %2202 = vmatpush3.msra.mxu0 %v45_v59  ;;  %v41_v63 = vld [vmem:[%s2697_s4 + $0x38] sm:$0xff]  ;;  %v40_v2 = vld [vmem:[%s2697_s4 + $0x30] sm:$0xff] }
 0x638   :  { %2172 = vmatmul.mubr.msk.f32.vlgmr.msra.gmra.mxu1 %vm62_vm0, %v1610_v3  ;;  %2203 = vmatprep.subr.mxu0 %v44_v60  ;;  %v39_v3 = vld [vmem:[%s2697_s4 + $0x28] sm:$0xff] }
 0x639   :  { %2175 = vmatpush3.msra.mxu1 %v1755_v20  ;;  %2204 = vmatpush3.msra.mxu0 %v44_v60 }
 0x63a   :  { %2176 = vmatprep.subr.mxu1 %v1754_v21  ;;  %2205 = vmatprep.subr.mxu0 %v43_v61 }
 0x63b   :  { %2177 = vmatpush3.msra.mxu1 %v1754_v21  ;;  %2206 = vmatpush3.msra.mxu0 %v43_v61 }
 0x63c   :  { %2178 = vmatprep.subr.mxu1 %v1753_v22  ;;  %2207 = vmatprep.subr.mxu0 %v42_v62 }
 0x63d   :  { %2179 = vmatpush3.msra.mxu1 %v1753_v22  ;;  %2208 = vmatpush3.msra.mxu0 %v42_v62 }
 0x63e   :  { %2180 = vmatprep.subr.mxu1 %v1752_v23  ;;  %2209 = vmatprep.subr.mxu0 %v41_v63 }
 0x63f   :  { %2181 = vmatpush3.msra.mxu1 %v1752_v23  ;;  %2210 = vmatpush3.msra.mxu0 %v41_v63 }
 0x640   :  { %2211 = vmatprep.subr.mxu0 %v40_v2 }
 0x641   :  { %2212 = vmatpush3.msra.mxu0 %v40_v2 }
 0x642   :  { %2213 = vmatprep.subr.mxu0 %v39_v3 }
 0x643   :  { %2214 = vmatpush3.msra.mxu0 %v39_v3 }
 0x6f8   :  { %v2173_v5 = vpop.f32.mrf.mxu1 }
 0x6f9   :  { %v1693_v6 = vadd.f32 %v2173_v5, %v2361_v1  ;;  %v2000_v5 = vld [vmem:[%s2698_s5 + $0x1] ss:$0 sm:$0xff] }
 0x6fa   :  { %v1683_v7 = vpop.f32.mrf.mxu1 }
 0x6fb   :  { %v2598_v8 = vadd.f32 %v1997_v4, %v1693_v6  ;;  %v1692_v9 = vadd.f32 %v1683_v7, %v2356_v0 }
 0x6fd   :  { %v2601_v57 = vadd.f32 %v1997_v4, %v1692_v9  ;;  %v1703_v10 = vsel %vm62_vm0, %v2598_v8, 0.0  ;;  %v38_v4 = vld [vmem:[%s2697_s4 + $0x20] sm:$0xff] }
 0x6fe   :  { %1704 = vadd.xlane.f32.xlu1 %v1703_v10  ;;  %2215 = vmatprep.subr.mxu0 %v38_v4 }
 0x6ff   :  { %v1700_v53 = vsel %vm62_vm0, %v2601_v57, 0.0  ;;  %2216 = vmatpush3.msra.mxu0 %v38_v4 }
 0x700   :  { %1701 = vadd.xlane.f32.xlu0 %v1700_v53 }
 0x787   :  { %v1705_v11 = vpop.xlane.xlu1 %1704 }
 0x788   :  { %v1707_v12 = vmul.f32 0.03125, %v1705_v11 }
 0x789   :  { %v1702_v13 = vpop.xlane.xlu0 %1701 }
 0x78a   :  { %v1706_v14 = vmul.f32 0.03125, %v1702_v13  ;;  %v1709_v1 = vsub.f32 %v2598_v8, %v1707_v12 }
 0x78c   :  { %v1708_v15 = vsub.f32 %v2601_v57, %v1706_v14  ;;  %v1711_v18 = vmul.f32 %v1709_v1, %v1709_v1  ;;  %v1739_v39 = vmul.f32 %v1998_v32, %v1709_v1 }
 0x78e   :  { %v1710_v17 = vmul.f32 %v1708_v15, %v1708_v15  ;;  %v1715_v19 = vsel %vm62_vm0, %v1711_v18, 0.0  ;;  %v1738_v33 = vmul.f32 %v1998_v32, %v1708_v15 }
 0x790   :  { %v1712_v0 = vsel %vm62_vm0, %v1710_v17, 0.0 }
 0x791   :  { %1713 = vadd.xlane.f32.xlu0 %v1712_v0 }
 0x795   :  { %1716 = vadd.xlane.f32.xlu0 %v1715_v19 }
 0x81a   :  { %v1714_v24 = vpop.xlane.xlu0 %1713 }
 0x81b   :  { %v1718_v51 = vmul.f32 0.032258064, %v1714_v24 }
 0x81d   :  { %2272 = vrsqrt.f32 %v1718_v51  ;;  %vm1722_vm9 = vcmp.eq.f32.partialorder %v1718_v51, inf  ;;  %v1725_v26 = vand.u32 2147483648, %v1718_v51  ;;  %vm1724_vm10 = vcmp.eq.f32.partialorder %v1718_v51, 0.0 }
 0x81e   :  { %v1717_v50 = vpop.xlane.xlu0 %1716 }
 0x81f   :  { %v1719_v48 = vmul.f32 0.032258064, %v1717_v50 }
 0x821   :  { %2274 = vrsqrt.f32 %v1719_v48  ;;  %vm1729_vm11 = vcmp.eq.f32.partialorder %v1719_v48, inf  ;;  %v1732_v16 = vand.u32 2147483648, %v1719_v48  ;;  %vm1731_vm12 = vcmp.eq.f32.partialorder %v1719_v48, 0.0 }
 0x82a   :  { %v2273_v25 = vpop.eup %2272 }
 0x82b   :  { %v1721_v52 = vmul.f32 %v2273_v25, %v1718_v51 }
 0x82d   :  { %v1723_v27 = vsel %vm1722_vm9, %v1718_v51, %v1721_v52 }
 0x82e   :  { %v2275_v49 = vpop.eup %2274  ;;  %v1726_v28 = vsel %vm1724_vm10, %v1725_v26, %v1723_v27 }
 0x82f   :  { %v1740_v29 = vadd.f32 1e-06, %v1726_v28  ;;  %v1728_v54 = vmul.f32 %v2275_v49, %v1719_v48 }
 0x831   :  { %2276 = vrcp.f32 %v1740_v29  ;;  %v1730_v44 = vsel %vm1729_vm11, %v1719_v48, %v1728_v54  ;;  %v2003_v48 = vld [vmem:[%s2697_s4 + $0xa5] ss:$0 sm:$0xff] }
 0x832   :  { %v1733_v30 = vsel %vm1731_vm12, %v1732_v16, %v1730_v44 }
 0x833   :  { %v1741_v31 = vadd.f32 1e-06, %v1733_v30 }
 0x835   :  { %2278 = vrcp.f32 %v1741_v31 }
 0x83e   :  { %v2277_v34 = vpop.eup %2276 }
 0x83f   :  { %v1743_v36 = vmul.f32 %v2277_v34, %v1738_v33 }
 0x841   :  { %v1750_v37 = vadd.f32 %v1999_v35, %v1743_v36 }
 0x842   :  { %v2279_v38 = vpop.eup %2278 }
 0x843   :  { %v1745_v40 = vmul.f32 %v2279_v38, %v1739_v39  ;;  %2182 = vmatprep.mubr.msk.f32.mxu1 %vm62_vm0, %v1750_v37 }
 0x845   :  { %v1751_v41 = vadd.f32 %v1999_v35, %v1745_v40 }
 0x847   :  { %2183 = vmatmul.mubr.msk.f32.vlgmr.msra.gmra.mxu1 %vm62_vm0, %v1751_v41 }
 0x907   :  { %v2184_v6 = vpop.f32.mrf.mxu1 }
 0x908   :  { %v1838_v7 = vadd.f32 %v2184_v6, %v2000_v5 }
 0x909   :  { %v1832_v9 = vpop.f32.mrf.mxu1 }
 0x90a   :  { %v1844_v10 = vmul.f32 %v1838_v7, %v1838_v7  ;;  %v1833_v53 = vadd.f32 %v2000_v5, %v1832_v9  ;;  %v1842_v24 = vmul.f32 0.5, %v1838_v7 }
 0x90c   :  { %v1846_v11 = vmul.f32 %v1844_v10, %v1838_v7  ;;  %v1843_v12 = vmul.f32 %v1833_v53, %v1833_v53  ;;  %v1841_v22 = vmul.f32 0.5, %v1833_v53 }
 0x90e   :  { %v1848_v13 = vmul.f32 0.044715, %v1846_v11  ;;  %v1845_v14 = vmul.f32 %v1843_v12, %v1833_v53 }
 0x910   :  { %v1850_v1 = vadd.f32 %v1848_v13, %v1838_v7  ;;  %v1847_v15 = vmul.f32 0.044715, %v1845_v14 }
 0x912   :  { %v1852_v17 = vmul.f32 0.7978846, %v1850_v1  ;;  %v1849_v0 = vadd.f32 %v1847_v15, %v1833_v53 }
 0x914   :  { %2280 = vtanh.f32 %v1852_v17  ;;  %v1851_v18 = vmul.f32 0.7978846, %v1849_v0 }
 0x916   :  { %2282 = vtanh.f32 %v1851_v18 }
 0x921   :  { %v2281_v19 = vpop.eup %2280 }
 0x922   :  { %v1856_v21 = vadd.f32 1.0, %v2281_v19 }
 0x923   :  { %v2283_v20 = vpop.eup %2282 }
 0x924   :  { %v1855_v23 = vadd.f32 1.0, %v2283_v20  ;;  %v1858_v50 = vmul.f32 %v1856_v21, %v1842_v24 }
 0x926   :  { %v1857_v51 = vmul.f32 %v1855_v23, %v1841_v22 }
 0x928   :  { %2217 = vmatprep.mubr.f32.mxu0 %v1857_v51 }
 0x929   :  { %2218 = vmatmul.mubr.f32.vlgmr.msra.gmra.mxu0 %v1858_v50 }
 0x9e9   :  { %v2219_v25 = vpop.f32.mrf.mxu0 }
 0x9ea   :  { %v1935_v52 = vadd.f32 %v2219_v25, %v2003_v48 }
 0x9eb   :  { %v1929_v26 = vpop.f32.mrf.mxu0 }
 0x9ec   :  { %v1939_v27 = vadd.f32 %v1935_v52, %v2598_v8  ;;  %v1930_v49 = vadd.f32 %v2003_v48, %v1929_v26 }
 0x9ee   :  { %1941 = vst.msk [vmem:[#allocation2 + $0x8] sm:$0xff] %vm62_vm0, %v1939_v27  ;;  %v1938_v28 = vadd.f32 %v1930_v49, %v2601_v57 }
 0x9f0   :  { %1940 = vst.msk [vmem:[#allocation2] sm:$0xff] %vm62_vm0, %v1938_v28 }
 0x9f1   :  { %2295 = shalt.err (!%p2292_p4)
}
 0x9f2   :  { %s2317_s4 = smov 128  }
 0x9f3   :  { %1953 = dma.vmem_to_hbm [thread:$0]  %s1948_s13, 256, %s2699_s6, [#allocation3], %s2317_s4, %s2317_s4, %s2314_s16  }
 0x9f4   :  { %2304 = dma.done.wait [#allocation3], 256  }
 0x9f5   :  { %2305 = vsyncadd [#allocation3], 4294967040 }
 0x9f6   :  { %1957 = vsyncpa [#allocation3], 1 }

</bundles_post_ra>
